<compile_context>
chip_gen: v7x
topology: tpu7x:2x2x1
jax: 0.10.0
libtpu: 0.0.40
codegen_flags: <defaults>
</compile_context>

<pallas_src>
import functools

import jax
import jax.numpy as jnp
from jax.experimental import pallas as pl
from jax.experimental.pallas import tpu as pltpu

# -------------------- "opt" hyper-parameters (deterministic, in-script) -----
N_NEGATIVE = 2          # opt.n_negative  (> 0 -> negative-sampling branch)
INFO_LAMDA = 0.5        # opt.info_lamda
CATGY_LAMDA = 0.3       # opt.catgy_lamda (> 0 -> scale catgy loss)
BETA = 1.0              # beta


def _loss_kernel(result_ref, target_ref, neg_ref, catgy_ref, tcat_ref,
                 info_ref, l2_ref,
                 rs_ref, click_ref, catgy_loss_ref,
                 click_acc, ce_acc,
                 *, batch_size):
    i = pl.program_id(0)

    # ------------- init accumulators on the first batch tile ----------------
    @pl.when(i == 0)
    def _init():
        click_acc[...] = jnp.zeros_like(click_acc)
        ce_acc[...] = jnp.zeros_like(ce_acc)

    # ------------- click loss partial (add_neg_loss) -------------------------
    x = result_ref[...].astype(jnp.float32)              # (TB, N), cast in VMEM
    tb, n = x.shape
    col = jax.lax.broadcasted_iota(jnp.int32, (tb, n), 1)

    m = jnp.max(x, axis=-1, keepdims=True)                # (TB, 1)
    e = jnp.exp(x - m)                                     # single EUP pass
    s = jnp.sum(e, axis=-1, keepdims=True)                 # (TB, 1)
    lse = m + jnp.log(s)                                   # logsumexp

    tgt = target_ref[...]                                  # (TB, 1) int32
    # gather x[b, target[b]] via iota mask (no scatter/gather op needed)
    pos_val = jnp.sum(jnp.where(col == tgt, x, 0.0), axis=-1, keepdims=True)
    pos_score = lse - pos_val                              # = -log softmax[b, t]

    neg = neg_ref[...]                                     # (TB, n_neg) int32
    neg_ll = jnp.zeros((tb, 1), jnp.float32)
    for j in range(neg.shape[1]):                          # n_negative small & static
        nj = neg[:, j:j + 1]                               # (TB, 1)
        # gather e at the negative index, reuse it for the softmax prob
        e_j = jnp.sum(jnp.where(col == nj, e, 0.0), axis=-1, keepdims=True)
        p_j = e_j / s                                      # softmax prob at neg idx
        # log only on (TB, 1) values; clamp for numerical safety (p -> 1)
        neg_ll = neg_ll - jnp.log(jnp.maximum(1.0 - p_j, 1e-12))

    click_acc[...] += jnp.sum(pos_score + BETA * neg_ll, keepdims=True)  # (1,1)

    # ------------- category loss partial (catgy_task_loss) -------------------
    cc = catgy_ref[...].astype(jnp.float32)                # (TB, D, C)
    logits = jnp.max(cc, axis=1)                           # max over demand -> (TB, C)
    mc = jnp.max(logits, axis=-1, keepdims=True)
    lsec = mc + jnp.log(jnp.sum(jnp.exp(logits - mc), axis=-1, keepdims=True))
    logp = logits - lsec                                   # log_softmax (TB, C)
    tcat = tcat_ref[...].astype(jnp.float32)               # (TB, C) soft labels
    ce_acc[...] += jnp.sum(-jnp.sum(tcat * logp, axis=-1, keepdims=True),
                           keepdims=True)                  # (1,1)

    # ------------- finalize on the last batch tile ---------------------------
    @pl.when(i == pl.num_programs(0) - 1)
    def _finalize():
        inv_b = 1.0 / batch_size
        click_loss = click_acc[0, 0] * inv_b
        ce_mean = ce_acc[0, 0] * inv_b
        catgy_loss = (CATGY_LAMDA * ce_mean) if CATGY_LAMDA > 0 else ce_mean
        rs_loss = click_loss + INFO_LAMDA * info_ref[0, 0] + l2_ref[0, 0]
        rs_ref[0, 0] = rs_loss
        click_ref[0, 0] = click_loss
        catgy_loss_ref[0, 0] = catgy_loss


def _pick_block_b(batch):
    # Largest batch tile (multiple of 8 sublanes) that divides B; real
    # deployments should also cap it by the VMEM budget: keep roughly
    # 2 * block_b * n_items * itemsize  <<  vmem_limit_bytes.
    for tb in (1024, 512, 256, 128, 64, 32, 16, 8):
        if tb <= batch and batch % tb == 0:
            return tb
    return batch


def loss_diy_forward(info_loss, l2_loss, result_click, target_item,
                     demand_sim_loss, neg_sample, catgy_click, target_catgy,
                     block_b=None):
    """Returns (rs_loss, click_loss, catgy_loss) as f32 scalars."""
    del demand_sim_loss  # unused by the reference forward as well
    B, n_items = result_click.shape
    _, demand_num, catgy_num = catgy_click.shape
    n_neg = neg_sample.shape[1]

    if block_b is None:
        block_b = _pick_block_b(B)
    assert B % block_b == 0, "batch must be divisible by block_b"
    grid = (B // block_b,)

    # Small index tensors only; big tensors are passed in their native dtype
    # (cast to f32 happens inside the kernel, after the tile is in VMEM).
    target_2d = target_item.astype(jnp.int32).reshape(B, 1)
    neg_2d = neg_sample.astype(jnp.int32)
    info_2d = jnp.asarray(info_loss, jnp.float32).reshape(1, 1)
    l2_2d = jnp.asarray(l2_loss, jnp.float32).reshape(1, 1)

    smem_scalar = pl.BlockSpec(memory_space=pltpu.MemorySpace.SMEM)
    out_scalar = jax.ShapeDtypeStruct((1, 1), jnp.float32)

    kernel = functools.partial(_loss_kernel, batch_size=B)

    rs, click, catgy = pl.pallas_call(
        kernel,
        grid=grid,
        out_shape=(out_scalar, out_scalar, out_scalar),
        in_specs=[
            pl.BlockSpec((block_b, n_items), lambda i: (i, 0)),
            pl.BlockSpec((block_b, 1), lambda i: (i, 0)),
            pl.BlockSpec((block_b, n_neg), lambda i: (i, 0)),
            pl.BlockSpec((block_b, demand_num, catgy_num), lambda i: (i, 0, 0)),
            pl.BlockSpec((block_b, catgy_num), lambda i: (i, 0)),
            smem_scalar,   # info_loss
            smem_scalar,   # l2_loss
        ],
        out_specs=(smem_scalar, smem_scalar, smem_scalar),
        scratch_shapes=[pltpu.VMEM((1, 1), jnp.float32),   # click-loss accumulator
                        pltpu.VMEM((1, 1), jnp.float32)],  # category-CE accumulator
        compiler_params=pltpu.CompilerParams(
            dimension_semantics=("arbitrary",),            # cross-tile accumulation
            vmem_limit_bytes=32 * 1024 * 1024),
    )(result_click, target_2d, neg_2d, catgy_click, target_catgy,
      info_2d, l2_2d)

    return rs[0, 0], click[0, 0], catgy[0, 0]


# -------------------------- pure-JAX reference -------------------------------
def _reference(info_loss, l2_loss, result_click, target_item,
               neg_sample, catgy_click, target_catgy):
    B, N = result_click.shape
    p = jax.nn.softmax(result_click, axis=1)
    pos = -jnp.log(p[jnp.arange(B), target_item])
    neg_p = jnp.take(p.reshape(-1),
                     (jnp.arange(B)[:, None] * N + neg_sample).reshape(-1)
                     ).reshape(B, -1)
    neg = -jnp.log(1.0 - neg_p).sum(-1)
    click = jnp.mean(pos + BETA * neg)
    rs = click + INFO_LAMDA * info_loss + l2_loss
    logits = jnp.max(catgy_click, axis=1)
    logp = jax.nn.log_softmax(logits, axis=-1)
    ce = jnp.mean(-jnp.sum(target_catgy * logp, axis=-1))
    catgy = CATGY_LAMDA * ce if CATGY_LAMDA > 0 else ce
    return rs, click, catgy


if __name__ == "__main__":
    key = jax.random.PRNGKey(0)
    k1, k2, k3, k4, k5, k6, k7 = jax.random.split(key, 7)

    B, N_ITEMS, DEMAND, CATGY = 16, 256, 3, 8

    result_click = jax.random.normal(k1, (B, N_ITEMS), jnp.float32)
    target_item = jax.random.randint(k2, (B,), 0, N_ITEMS, jnp.int32)
    neg_sample = jax.random.randint(k3, (B, N_NEGATIVE), 0, N_ITEMS, jnp.int32)
    catgy_click = jax.random.normal(k4, (B, DEMAND, CATGY), jnp.float32)
    # soft (probability) category targets, per docstring B x catgy_num
    target_catgy = jax.nn.softmax(jax.random.normal(k5, (B, CATGY), jnp.float32), -1)
    info_loss = jnp.abs(jax.random.normal(k6, (), jnp.float32))
    l2_loss = jnp.abs(jax.random.normal(k7, (), jnp.float32)) * 0.01
    demand_sim_loss = jnp.float32(0.0)  # unused in forward, kept for signature parity

    # block_b=8 -> grid of 2 batch tiles, exercising the accumulate/finalize path.
    outs = loss_diy_forward(info_loss, l2_loss, result_click, target_item,
                            demand_sim_loss, neg_sample, catgy_click, target_catgy,
                            block_b=8)
    outs = jax.block_until_ready(outs)

    refs = _reference(info_loss, l2_loss, result_click, target_item,
                      neg_sample, catgy_click, target_catgy)
    for got, ref in zip(outs, refs):
        assert jnp.allclose(got, ref, rtol=1e-4, atol=1e-5), (got, ref)

    print("KERNEL_OK")
</pallas_src>

<mosaic_0001>
module attributes {stable_mosaic.version = 11 : i64} {
  func.func @_loss_kernel(%arg0: i32, %arg1: memref<8x256xf32, #tpu.memory_space<vmem>>, %arg2: memref<8x1xi32, #tpu.memory_space<vmem>>, %arg3: memref<8x2xi32, #tpu.memory_space<vmem>>, %arg4: memref<8x3x8xf32, #tpu.memory_space<vmem>>, %arg5: memref<8x8xf32, #tpu.memory_space<vmem>>, %arg6: memref<1x1xf32, #tpu.memory_space<smem>>, %arg7: memref<1x1xf32, #tpu.memory_space<smem>>, %arg8: memref<1x1xf32, #tpu.memory_space<smem>>, %arg9: memref<1x1xf32, #tpu.memory_space<smem>>, %arg10: memref<1x1xf32, #tpu.memory_space<smem>>, %arg11: memref<1x1xf32, #tpu.memory_space<vmem>>, %arg12: memref<1x1xf32, #tpu.memory_space<vmem>>) attributes {dimension_semantics = [#tpu.dimension_semantics<arbitrary>], iteration_bounds = array<i64: 2>, scalar_prefetch = 0 : i64, scratch_operands = 2 : i64, tpu.core_type = #tpu.core_type<tc>, window_params = [{transform_indices = @transform_0, window_bounds = array<i64: 8, 256>}, {transform_indices = @transform_1, window_bounds = array<i64: 8, 1>}, {transform_indices = @transform_2, window_bounds = array<i64: 8, 2>}, {transform_indices = @transform_3, window_bounds = array<i64: 8, 3, 8>}, {transform_indices = @transform_4, window_bounds = array<i64: 8, 8>}, {transform_indices = @transform_5, window_bounds = array<i64: 1, 1>}, {transform_indices = @transform_6, window_bounds = array<i64: 1, 1>}, {transform_indices = @transform_7, window_bounds = array<i64: 1, 1>}, {transform_indices = @transform_8, window_bounds = array<i64: 1, 1>}, {transform_indices = @transform_9, window_bounds = array<i64: 1, 1>}]} {
    %c0_i32 = arith.constant 0 : i32
    %0 = arith.cmpi eq, %arg0, %c0_i32 : i32
    %1 = arith.extui %0 : i1 to i32
    %c0_i32_0 = arith.constant 0 : i32
    %2 = arith.cmpi ne, %1, %c0_i32_0 : i32
    scf.if %2 {
      %cst_40 = arith.constant 0.000000e+00 : f32
      %93 = vector.broadcast %cst_40 : f32 to vector<1x1xf32>
      %c0_41 = arith.constant 0 : index
      %c0_42 = arith.constant 0 : index
      %94 = vector.load %arg11[%c0_41, %c0_42] : memref<1x1xf32, #tpu.memory_space<vmem>>, vector<1x1xf32>
      tpu.vector_store %arg11[%c0_41, %c0_42], %93 {strides = array<i32>} : memref<1x1xf32, #tpu.memory_space<vmem>>, vector<1x1xf32>,
      %cst_43 = arith.constant 0.000000e+00 : f32
      %95 = vector.broadcast %cst_43 : f32 to vector<1x1xf32>
      %c0_44 = arith.constant 0 : index
      %c0_45 = arith.constant 0 : index
      %96 = vector.load %arg12[%c0_44, %c0_45] : memref<1x1xf32, #tpu.memory_space<vmem>>, vector<1x1xf32>
      tpu.vector_store %arg12[%c0_44, %c0_45], %95 {strides = array<i32>} : memref<1x1xf32, #tpu.memory_space<vmem>>, vector<1x1xf32>,
    } else {
    }
    %c0 = arith.constant 0 : index
    %c0_1 = arith.constant 0 : index
    %3 = vector.load %arg1[%c0, %c0_1] : memref<8x256xf32, #tpu.memory_space<vmem>>, vector<8x256xf32>
    %4 = tpu.iota {dimensions = array<i32: 1>} : vector<8x256xi32>
    %cst = arith.constant dense<0xFF800000> : vector<8xf32>
    %5 = vector.multi_reduction <maximumf>, %3, %cst [1] : vector<8x256xf32> to vector<8xf32>
    %6 = vector.shape_cast %5 : vector<8xf32> to vector<8x1xf32>
    %7 = vector.broadcast %6 : vector<8x1xf32> to vector<8x256xf32>
    %8 = arith.subf %3, %7 : vector<8x256xf32>
    %9 = math.exp %8 : vector<8x256xf32>
    %cst_2 = arith.constant dense<0.000000e+00> : vector<8xf32>
    %10 = vector.multi_reduction <add>, %9, %cst_2 [1] : vector<8x256xf32> to vector<8xf32>
    %11 = vector.shape_cast %10 : vector<8xf32> to vector<8x1xf32>
    %12 = math.log %11 : vector<8x1xf32>
    %13 = arith.addf %6, %12 : vector<8x1xf32>
    %c0_3 = arith.constant 0 : index
    %c0_4 = arith.constant 0 : index
    %14 = vector.load %arg2[%c0_3, %c0_4] : memref<8x1xi32, #tpu.memory_space<vmem>>, vector<8x1xi32>
    %15 = vector.broadcast %14 : vector<8x1xi32> to vector<8x256xi32>
    %16 = arith.cmpi eq, %4, %15 : vector<8x256xi32>
    %cst_5 = arith.constant 0.000000e+00 : f32
    %17 = vector.broadcast %cst_5 : f32 to vector<8x256xf32>
    %18 = arith.select %16, %3, %17 : vector<8x256xi1>, vector<8x256xf32>
    %cst_6 = arith.constant dense<0.000000e+00> : vector<8xf32>
    %19 = vector.multi_reduction <add>, %18, %cst_6 [1] : vector<8x256xf32> to vector<8xf32>
    %20 = vector.shape_cast %19 : vector<8xf32> to vector<8x1xf32>
    %21 = arith.subf %13, %20 : vector<8x1xf32>
    %c0_7 = arith.constant 0 : index
    %c0_8 = arith.constant 0 : index
    %22 = vector.load %arg3[%c0_7, %c0_8] : memref<8x2xi32, #tpu.memory_space<vmem>>, vector<8x2xi32>
    %cst_9 = arith.constant 0.000000e+00 : f32
    %23 = vector.broadcast %cst_9 : f32 to vector<8x1xf32>
    %24 = vector.extract_strided_slice %22 {offsets = [0, 0], sizes = [8, 1], strides = [1, 1]} : vector<8x2xi32> to vector<8x1xi32>
    %25 = vector.broadcast %24 : vector<8x1xi32> to vector<8x256xi32>
    %26 = arith.cmpi eq, %4, %25 : vector<8x256xi32>
    %cst_10 = arith.constant 0.000000e+00 : f32
    %27 = vector.broadcast %cst_10 : f32 to vector<8x256xf32>
    %28 = arith.select %26, %9, %27 : vector<8x256xi1>, vector<8x256xf32>
    %cst_11 = arith.constant dense<0.000000e+00> : vector<8xf32>
    %29 = vector.multi_reduction <add>, %28, %cst_11 [1] : vector<8x256xf32> to vector<8xf32>
    %30 = vector.shape_cast %29 : vector<8xf32> to vector<8x1xf32>
    %31 = arith.divf %30, %11 : vector<8x1xf32>
    %cst_12 = arith.constant 1.000000e+00 : f32
    %32 = vector.broadcast %cst_12 : f32 to vector<8x1xf32>
    %33 = arith.subf %32, %31 : vector<8x1xf32>
    %cst_13 = arith.constant 9.99999996E-13 : f32
    %34 = vector.broadcast %cst_13 : f32 to vector<8x1xf32>
    %35 = arith.maximumf %33, %34 : vector<8x1xf32>
    %36 = math.log %35 : vector<8x1xf32>
    %37 = arith.subf %23, %36 : vector<8x1xf32>
    %38 = vector.extract_strided_slice %22 {offsets = [0, 1], sizes = [8, 1], strides = [1, 1]} : vector<8x2xi32> to vector<8x1xi32>
    %39 = vector.broadcast %38 : vector<8x1xi32> to vector<8x256xi32>
    %40 = arith.cmpi eq, %4, %39 : vector<8x256xi32>
    %cst_14 = arith.constant 0.000000e+00 : f32
    %41 = vector.broadcast %cst_14 : f32 to vector<8x256xf32>
    %42 = arith.select %40, %9, %41 : vector<8x256xi1>, vector<8x256xf32>
    %cst_15 = arith.constant dense<0.000000e+00> : vector<8xf32>
    %43 = vector.multi_reduction <add>, %42, %cst_15 [1] : vector<8x256xf32> to vector<8xf32>
    %44 = vector.shape_cast %43 : vector<8xf32> to vector<8x1xf32>
    %45 = arith.divf %44, %11 : vector<8x1xf32>
    %cst_16 = arith.constant 1.000000e+00 : f32
    %46 = vector.broadcast %cst_16 : f32 to vector<8x1xf32>
    %47 = arith.subf %46, %45 : vector<8x1xf32>
    %cst_17 = arith.constant 9.99999996E-13 : f32
    %48 = vector.broadcast %cst_17 : f32 to vector<8x1xf32>
    %49 = arith.maximumf %47, %48 : vector<8x1xf32>
    %50 = math.log %49 : vector<8x1xf32>
    %51 = arith.subf %37, %50 : vector<8x1xf32>
    %c0_18 = arith.constant 0 : index
    %c0_19 = arith.constant 0 : index
    %52 = vector.load %arg11[%c0_18, %c0_19] : memref<1x1xf32, #tpu.memory_space<vmem>>, vector<1x1xf32>
    %cst_20 = arith.constant 1.000000e+00 : f32
    %53 = vector.broadcast %cst_20 : f32 to vector<8x1xf32>
    %54 = arith.mulf %53, %51 : vector<8x1xf32>
    %55 = arith.addf %21, %54 : vector<8x1xf32>
    %56 = vector.shape_cast %55 : vector<8x1xf32> to vector<1x8x1xf32>
    %cst_21 = arith.constant dense<0.000000e+00> : vector<1xf32>
    %57 = vector.multi_reduction <add>, %56, %cst_21 [1, 2] : vector<1x8x1xf32> to vector<1xf32>
    %58 = vector.shape_cast %57 : vector<1xf32> to vector<1x1x1xf32>
    %59 = vector.extract %58[0, 0, 0] : f32 from vector<1x1x1xf32>
    %60 = vector.broadcast %59 : f32 to vector<1x1xf32>
    %61 = arith.addf %52, %60 : vector<1x1xf32>
    %c0_22 = arith.constant 0 : index
    %c0_23 = arith.constant 0 : index
    %62 = vector.load %arg11[%c0_22, %c0_23] : memref<1x1xf32, #tpu.memory_space<vmem>>, vector<1x1xf32>
    tpu.vector_store %arg11[%c0_22, %c0_23], %61 {strides = array<i32>} : memref<1x1xf32, #tpu.memory_space<vmem>>, vector<1x1xf32>,
    %c0_24 = arith.constant 0 : index
    %c0_25 = arith.constant 0 : index
    %c0_26 = arith.constant 0 : index
    %63 = vector.load %arg4[%c0_24, %c0_25, %c0_26] : memref<8x3x8xf32, #tpu.memory_space<vmem>>, vector<8x3x8xf32>
    %cst_27 = arith.constant dense<0xFF800000> : vector<8x8xf32>
    %64 = vector.multi_reduction <maximumf>, %63, %cst_27 [1] : vector<8x3x8xf32> to vector<8x8xf32>
    %cst_28 = arith.constant dense<0xFF800000> : vector<8xf32>
    %65 = vector.multi_reduction <maximumf>, %64, %cst_28 [1] : vector<8x8xf32> to vector<8xf32>
    %66 = vector.shape_cast %65 : vector<8xf32> to vector<8x1xf32>
    %67 = vector.broadcast %66 : vector<8x1xf32> to vector<8x8xf32>
    %68 = arith.subf %64, %67 : vector<8x8xf32>
    %69 = math.exp %68 : vector<8x8xf32>
    %cst_29 = arith.constant dense<0.000000e+00> : vector<8xf32>
    %70 = vector.multi_reduction <add>, %69, %cst_29 [1] : vector<8x8xf32> to vector<8xf32>
    %71 = vector.shape_cast %70 : vector<8xf32> to vector<8x1xf32>
    %72 = math.log %71 : vector<8x1xf32>
    %73 = arith.addf %66, %72 : vector<8x1xf32>
    %74 = vector.broadcast %73 : vector<8x1xf32> to vector<8x8xf32>
    %75 = arith.subf %64, %74 : vector<8x8xf32>
    %c0_30 = arith.constant 0 : index
    %c0_31 = arith.constant 0 : index
    %76 = vector.load %arg5[%c0_30, %c0_31] : memref<8x8xf32, #tpu.memory_space<vmem>>, vector<8x8xf32>
    %c0_32 = arith.constant 0 : index
    %c0_33 = arith.constant 0 : index
    %77 = vector.load %arg12[%c0_32, %c0_33] : memref<1x1xf32, #tpu.memory_space<vmem>>, vector<1x1xf32>
    %78 = arith.mulf %76, %75 : vector<8x8xf32>
    %cst_34 = arith.constant dense<0.000000e+00> : vector<8xf32>
    %79 = vector.multi_reduction <add>, %78, %cst_34 [1] : vector<8x8xf32> to vector<8xf32>
    %80 = vector.shape_cast %79 : vector<8xf32> to vector<8x1xf32>
    %cst_35 = arith.constant 0.000000e+00 : f32
    %81 = vector.broadcast %cst_35 : f32 to vector<8x1xf32>
    %82 = arith.subf %81, %80 : vector<8x1xf32>
    %83 = vector.shape_cast %82 : vector<8x1xf32> to vector<1x8x1xf32>
    %cst_36 = arith.constant dense<0.000000e+00> : vector<1xf32>
    %84 = vector.multi_reduction <add>, %83, %cst_36 [1, 2] : vector<1x8x1xf32> to vector<1xf32>
    %85 = vector.shape_cast %84 : vector<1xf32> to vector<1x1x1xf32>
    %86 = vector.extract %85[0, 0, 0] : f32 from vector<1x1x1xf32>
    %87 = vector.broadcast %86 : f32 to vector<1x1xf32>
    %88 = arith.addf %77, %87 : vector<1x1xf32>
    %c0_37 = arith.constant 0 : index
    %c0_38 = arith.constant 0 : index
    %89 = vector.load %arg12[%c0_37, %c0_38] : memref<1x1xf32, #tpu.memory_space<vmem>>, vector<1x1xf32>
    tpu.vector_store %arg12[%c0_37, %c0_38], %88 {strides = array<i32>} : memref<1x1xf32, #tpu.memory_space<vmem>>, vector<1x1xf32>,
    %c1_i32 = arith.constant 1 : i32
    %90 = arith.cmpi eq, %arg0, %c1_i32 : i32
    %91 = arith.extui %90 : i1 to i32
    %c0_i32_39 = arith.constant 0 : i32
    %92 = arith.cmpi ne, %91, %c0_i32_39 : i32
    scf.if %92 {
      %c0_40 = arith.constant 0 : index
      %c0_41 = arith.constant 0 : index
      %93 = vector.load %arg11[%c0_40, %c0_41] : memref<1x1xf32, #tpu.memory_space<vmem>>, vector<1x1xf32>
      %94 = vector.extract %93[0, 0] : f32 from vector<1x1xf32>
      %cst_42 = arith.constant 6.250000e-02 : f32
      %95 = arith.mulf %94, %cst_42 : f32
      %c0_43 = arith.constant 0 : index
      %c0_44 = arith.constant 0 : index
      %96 = vector.load %arg12[%c0_43, %c0_44] : memref<1x1xf32, #tpu.memory_space<vmem>>, vector<1x1xf32>
      %97 = vector.extract %96[0, 0] : f32 from vector<1x1xf32>
      %cst_45 = arith.constant 6.250000e-02 : f32
      %98 = arith.mulf %97, %cst_45 : f32
      %cst_46 = arith.constant 3.000000e-01 : f32
      %99 = arith.mulf %cst_46, %98 : f32
      %c0_47 = arith.constant 0 : index
      %c0_48 = arith.constant 0 : index
      %100 = memref.load %arg6[%c0_47, %c0_48] : memref<1x1xf32, #tpu.memory_space<smem>>
      %cst_49 = arith.constant 5.000000e-01 : f32
      %101 = arith.mulf %cst_49, %100 : f32
      %102 = arith.addf %95, %101 : f32
      %c0_50 = arith.constant 0 : index
      %c0_51 = arith.constant 0 : index
      %103 = memref.load %arg7[%c0_50, %c0_51] : memref<1x1xf32, #tpu.memory_space<smem>>
      %104 = arith.addf %102, %103 : f32
      %c0_52 = arith.constant 0 : index
      %c0_53 = arith.constant 0 : index
      %105 = memref.load %arg8[%c0_52, %c0_53] : memref<1x1xf32, #tpu.memory_space<smem>>
      memref.store %104, %arg8[%c0_52, %c0_53] : memref<1x1xf32, #tpu.memory_space<smem>>
      %c0_54 = arith.constant 0 : index
      %c0_55 = arith.constant 0 : index
      %106 = memref.load %arg9[%c0_54, %c0_55] : memref<1x1xf32, #tpu.memory_space<smem>>
      memref.store %95, %arg9[%c0_54, %c0_55] : memref<1x1xf32, #tpu.memory_space<smem>>
      %c0_56 = arith.constant 0 : index
      %c0_57 = arith.constant 0 : index
      %107 = memref.load %arg10[%c0_56, %c0_57] : memref<1x1xf32, #tpu.memory_space<smem>>
      memref.store %99, %arg10[%c0_56, %c0_57] : memref<1x1xf32, #tpu.memory_space<smem>>
    } else {
    }
    return
  }
  func.func @transform_0(%arg0: i32) -> (i32, i32) {
    %c0_i32 = arith.constant 0 : i32
    %c0_i32_0 = arith.constant 0 : i32
    return %arg0, %c0_i32 : i32, i32
  }
  func.func @transform_1(%arg0: i32) -> (i32, i32) {
    %c0_i32 = arith.constant 0 : i32
    %c0_i32_0 = arith.constant 0 : i32
    return %arg0, %c0_i32 : i32, i32
  }
  func.func @transform_2(%arg0: i32) -> (i32, i32) {
    %c0_i32 = arith.constant 0 : i32
    %c0_i32_0 = arith.constant 0 : i32
    return %arg0, %c0_i32 : i32, i32
  }
  func.func @transform_3(%arg0: i32) -> (i32, i32, i32) {
    %c0_i32 = arith.constant 0 : i32
    %c0_i32_0 = arith.constant 0 : i32
    %c0_i32_1 = arith.constant 0 : i32
    return %arg0, %c0_i32, %c0_i32_0 : i32, i32, i32
  }
  func.func @transform_4(%arg0: i32) -> (i32, i32) {
    %c0_i32 = arith.constant 0 : i32
    %c0_i32_0 = arith.constant 0 : i32
    return %arg0, %c0_i32 : i32, i32
  }
  func.func @transform_5(%arg0: i32) -> (i32, i32) {
    %c0_i32 = arith.constant 0 : i32
    %c0_i32_0 = arith.constant 0 : i32
    %c0_i32_1 = arith.constant 0 : i32
    return %c0_i32, %c0_i32_0 : i32, i32
  }
  func.func @transform_6(%arg0: i32) -> (i32, i32) {
    %c0_i32 = arith.constant 0 : i32
    %c0_i32_0 = arith.constant 0 : i32
    %c0_i32_1 = arith.constant 0 : i32
    return %c0_i32, %c0_i32_0 : i32, i32
  }
  func.func @transform_7(%arg0: i32) -> (i32, i32) {
    %c0_i32 = arith.constant 0 : i32
    %c0_i32_0 = arith.constant 0 : i32
    %c0_i32_1 = arith.constant 0 : i32
    return %c0_i32, %c0_i32_0 : i32, i32
  }
  func.func @transform_8(%arg0: i32) -> (i32, i32) {
    %c0_i32 = arith.constant 0 : i32
    %c0_i32_0 = arith.constant 0 : i32
    %c0_i32_1 = arith.constant 0 : i32
    return %c0_i32, %c0_i32_0 : i32, i32
  }
  func.func @transform_9(%arg0: i32) -> (i32, i32) {
    %c0_i32 = arith.constant 0 : i32
    %c0_i32_0 = arith.constant 0 : i32
    %c0_i32_1 = arith.constant 0 : i32
    return %c0_i32, %c0_i32_0 : i32, i32
  }
}

</mosaic_0001>

<bundles_post_ra>
// kernel: tpu_custom_call.1
= control target key start
LH: loop header
LB: loop body
LE: loop exit
PB: predicated region body
PF: predicated region fallthrough
CT: control target
= control target key end

     0   :  { %s1274_s0 = inlined_call_operand.vmem [shape: f32[16,256], index: 0, kind: input, shape index: {}]   ;;  %s1275_s1 = inlined_call_operand.vmem [shape: s32[16,1], index: 1, kind: input, shape index: {}]   ;;  %s1276_s2 = inlined_call_operand.vmem [shape: s32[16,2], index: 2, kind: input, shape index: {}]   ;;  %s1277_s3 = inlined_call_operand.vmem [shape: f32[16,3,8], index: 3, kind: input, shape index: {}]   ;;  %s1278_s4 = inlined_call_operand.vmem [shape: f32[16,8], index: 4, kind: input, shape index: {}]   ;;  %s1279_s5 = inlined_call_operand.<no memory space> [shape: f32[1,1], index: 5, kind: input, shape index: {}]   ;;  %s1280_s6 = inlined_call_operand.<no memory space> [shape: f32[1,1], index: 6, kind: input, shape index: {}]   ;;  %s1281_s7 = inlined_call_operand.hbm [shape: f32[1,1], index: 7, kind: output, shape index: {0}]   ;;  %s1282_s8 = inlined_call_operand.hbm [shape: f32[1,1], index: 8, kind: output, shape index: {1}]   ;;  %s1283_s9 = inlined_call_operand.hbm [shape: f32[1,1], index: 9, kind: output, shape index: {2}]  }
   0x1   :  { %15 = sst [smem:[#allocation4]] %s1279_s5 }
   0x2   :  { %16 = sst [smem:[#allocation5]] %s1280_s6 }
   0x3   :  { %17 = vsyncpa [#allocation7], 0 }
   0x4   :  { %18 = vsyncpa [#allocation9], 0  ;;  %s1070_s13 = smov 0  }
   0x5 LB: > { %s1076_s14 = sadd.s32 4294967295, %s1006_s13   ;;  %p865_p0 = scmp.ge.s32.totalorder %s1006_s13, 1  ;;  %s1006_s13 = sphi %s1070_s13, %s24_s13  }
   0x6   : > { %p319_p1 = scmp.lt.s32.totalorder %s1006_s13, 3 }
   0x8   : > { %p320_p2 = pnand %p865_p0, %p319_p1 }
   0x9   : > { %p367_p3 = scmp.lt.s32.totalorder (!%p320_p2), %s1076_s14, 1  ;;  %s870_s5 = sshll.u32 (!%p320_p2), %s1076_s14, 3 }
   0xa   : > { %323 = sbr.rel (%p320_p2) target bundleno = 845 (0x34d), region = 48  ;;  %p381_p4 = scmp.lt.s32.totalorder (!%p320_p2), %s870_s5, 15 }
   0xb   : > { %p873_p5 = scmp.ne.s32.totalorder (!%p320_p2), %s1076_s14, 0 }
  0x11   : > { %s368_s6 = scalar_select %p367_p3, %s1076_s14, 1 }
  0x12   : > { %s1285_s5 = smov (!%p381_p4, %s870_s5), 15  ;;  %393 = sbr.rel (%p873_p5) target bundleno = 25 (0x19), region = 52 }
  0x13   : > { %s883_s15 = sshll.u32 %s368_s6, 4  ;;  %s1083_s16 = sshll.u32 %s368_s6, 3  ;;  %vm394_vm0 = vcmask (!%p873_p5), 0   ;;  %v1008_v0 = vmov (!%p873_p5), 0.0  }
  0x14   : > { %s1088_s19 = scalar_lea.vmem %s1274_s0, %s883_s15  ;;  %s375_s22 = scalar_lea.vmem %s1275_s1, %s1083_s16  ;;  %395 = vst.msk [vmem:[#allocation2] sm:$0x1] (!%p873_p5), %vm394_vm0, %v1008_v0  ;;  %396 = vst.msk [vmem:[#allocation3] sm:$0x1] (!%p873_p5), %vm394_vm0, %v1008_v0 }
  0x15   : > { %s379_s25 = scalar_lea.vmem %s1276_s2, %s1083_s16  ;;  %s871_s26 = sshll.u32 %s1285_s5, 2 }
  0x16   : > { %s384_s29 = scalar_lea.vmem %s1277_s3, %s871_s26  ;;  %s389_s11 = scalar_lea.vmem %s1278_s4, %s1083_s16 }
  0x19 PF: > { %v480_v1 = vld [vmem:[%s384_s29] sm:$0x7]  ;;  %v481_v2 = vld [vmem:[%s384_s29 + $0x4] sm:$0x7]  ;;  %v482_v3 = vld [vmem:[%s384_s29 + $0x8] sm:$0x7] }
  0x1a   : > { %v483_v4 = vld [vmem:[%s384_s29 + $0xc] sm:$0x7]  ;;  %v484_v5 = vld [vmem:[%s384_s29 + $0x10] sm:$0x7]  ;;  %v485_v6 = vld [vmem:[%s384_s29 + $0x14] sm:$0x7] }
  0x1b   : > { %v486_v7 = vld [vmem:[%s384_s29 + $0x18] sm:$0x7]  ;;  %v487_v8 = vld [vmem:[%s384_s29 + $0x1c] sm:$0x7]  ;;  %vm488_vm1 = vcmask 59392   ;;  %vm553_vm2 = vcmask 1041409  }
  0x1c   : > { %v489_v9 = vsel %vm488_vm1, %v480_v1, -inf  ;;  %v496_v10 = vsel %vm488_vm1, %v481_v2, -inf  ;;  %v503_v11 = vsel %vm488_vm1, %v482_v3, -inf  ;;  %v510_v12 = vsel %vm488_vm1, %v483_v4, -inf  ;;  %v429_v2 = vld [vmem:[%s379_s25] sm:$0xff]  ;;  %p874_p6 = scmp.ne.s32.totalorder %s1076_s14, 1 }
  0x1d   : > { %v490_v13 = vrot.slane %v489_v9, 4  ;;  %v497_v14 = vrot.slane %v496_v10, 4  ;;  %v504_v15 = vrot.slane %v503_v11, 4  ;;  %v511_v16 = vrot.slane %v510_v12, 4  ;;  %s719_s20 = sld [smem:[#allocation4]] (!%p874_p6) }
  0x1e   : > { %v517_v17 = vsel %vm488_vm1, %v484_v5, -inf  ;;  %v524_v18 = vsel %vm488_vm1, %v485_v6, -inf  ;;  %v531_v19 = vsel %vm488_vm1, %v486_v7, -inf  ;;  %v538_v20 = vsel %vm488_vm1, %v487_v8, -inf  ;;  %s722_s21 = sld [smem:[#allocation5]] (!%p874_p6) }
  0x1f   : > { %v491_v21 = vmax.f32 %v489_v9, %v490_v13  ;;  %v498_v22 = vmax.f32 %v496_v10, %v497_v14  ;;  %v505_v23 = vmax.f32 %v503_v11, %v504_v15  ;;  %v512_v24 = vmax.f32 %v510_v12, %v511_v16  ;;  %v1141_v10 = vld [vmem:[%s1088_s19] sm:$0xff]  ;;  %v1144_v11 = vld [vmem:[%s1088_s19 + $0x8] sm:$0xff] }
  0x20   : > { %v518_v25 = vrot.slane %v517_v17, 4  ;;  %v525_v26 = vrot.slane %v524_v18, 4  ;;  %v532_v27 = vrot.slane %v531_v19, 4  ;;  %v539_v28 = vrot.slane %v538_v20, 4 }
  0x21   : > { %v492_v29 = vrot.slane %v491_v21, 2  ;;  %v499_v30 = vrot.slane %v498_v22, 2  ;;  %v506_v31 = vrot.slane %v505_v23, 2  ;;  %v513_v32 = vrot.slane %v512_v24, 2 }
  0x22   : > { %v519_v33 = vmax.f32 %v517_v17, %v518_v25  ;;  %v526_v34 = vmax.f32 %v524_v18, %v525_v26  ;;  %v533_v35 = vmax.f32 %v531_v19, %v532_v27  ;;  %v540_v36 = vmax.f32 %v538_v20, %v539_v28 }
  0x23   : > { %v493_v37 = vmax.f32 %v491_v21, %v492_v29  ;;  %v500_v38 = vmax.f32 %v498_v22, %v499_v30  ;;  %v507_v39 = vmax.f32 %v505_v23, %v506_v31  ;;  %v514_v40 = vmax.f32 %v512_v24, %v513_v32 }
  0x24   : > { %v520_v41 = vrot.slane %v519_v33, 2  ;;  %v527_v42 = vrot.slane %v526_v34, 2  ;;  %v534_v43 = vrot.slane %v533_v35, 2  ;;  %v541_v44 = vrot.slane %v540_v36, 2 }
  0x25   : > { %v494_v45 = vrot.slane %v493_v37, 1  ;;  %v501_v46 = vrot.slane %v500_v38, 1  ;;  %v508_v47 = vrot.slane %v507_v39, 1  ;;  %v515_v48 = vrot.slane %v514_v40, 1 }
  0x26   : > { %v521_v49 = vmax.f32 %v519_v33, %v520_v41  ;;  %v528_v50 = vmax.f32 %v526_v34, %v527_v42  ;;  %v535_v51 = vmax.f32 %v533_v35, %v534_v43  ;;  %v542_v52 = vmax.f32 %v540_v36, %v541_v44 }
  0x27   : > { %v1106_v53 = vmax.f32 %v493_v37, %v494_v45  ;;  %v1108_v54 = vmax.f32 %v500_v38, %v501_v46  ;;  %v1110_v55 = vmax.f32 %v507_v39, %v508_v47  ;;  %v1112_v56 = vmax.f32 %v514_v40, %v515_v48 }
  0x28   : > { %v522_v57 = vrot.slane %v521_v49, 1  ;;  %v529_v58 = vrot.slane %v528_v50, 1  ;;  %v536_v59 = vrot.slane %v535_v51, 1  ;;  %v543_v60 = vrot.slane %v542_v52, 1 }
  0x29   : > { %v554_v61 = vsel %vm553_vm2, %v1108_v54, %v1106_v53  ;;  %vm555_vm3 = vcmask 1042434   ;;  %vm557_vm4 = vcmask 1043459   ;;  %vm559_vm5 = vcmask 1044484  }
  0x2a   : > { %v1117_v62 = vmax.f32 %v521_v49, %v522_v57  ;;  %v1119_v63 = vmax.f32 %v528_v50, %v529_v58  ;;  %v1121_v0 = vmax.f32 %v535_v51, %v536_v59  ;;  %v556_v1 = vsel %vm555_vm3, %v1110_v55, %v554_v61 }
  0x2b   : > { %vm561_vm6 = vcmask 1045509   ;;  %v1130_v3 = vmax.f32 %v542_v52, %v543_v60  ;;  %v558_v4 = vsel %vm557_vm4, %v1112_v56, %v556_v1  ;;  %vm563_vm7 = vcmask 1046534  }
  0x2c   : > { %v560_v5 = vsel %vm559_vm5, %v1117_v62, %v558_v4  ;;  %vm565_vm8 = vcmask 1047559   ;;  %v1009_v6 = vmov 0   ;;  %vm568_vm9 = vcmask 64512  }
  0x2d   : > { %924 = vset.pattern.permute.xlu1 %v1009_v6  ;;  %v562_v7 = vsel %vm561_vm6, %v1119_v63, %v560_v5  ;;  %v1010_v8 = vmov 1   ;;  %v402_v14 = vmax.f32 %v1141_v10, %v1144_v11  ;;  %v399_v44 = vlaneseq }
  0x2e   : > { %431 = vperm.xlu1 %924, %v429_v2   ;;  %925 = vset.pattern.permute.xlu0 %v1010_v8  ;;  %v564_v9 = vsel %vm563_vm7, %v1121_v0, %v562_v7  ;;  %vm465_vm0 = vcmask 7168   ;;  %vm478_vm1 = vcmask 0  }
  0x2f   : > { %v566_v12 = vsel %vm565_vm8, %v1130_v3, %v564_v9  ;;  %v400_v45 = vand.u32 127, %v399_v44 }
  0x30   : > { %v569_v13 = vsel %vm568_vm9, %v566_v12, -inf }
  0x31   : > { %570 = vmax.xlane.f32.xlu0 %v569_v13  ;;  %v401_v57 = vadd.s32 128, %v400_v45 }
  0x35   : > { %403 = vmax.xlane.f32.xlu0 %v402_v14 }
  0x4b   : > { %448 = vperm.xlu0 %925, %v429_v2  }
  0xad   : > { %v432_v52 = vpop.permute.xlu1 %431 }
  0xae   : > { %vm433_vm10 = vcmp.eq.s32.totalorder %v400_v45, %v432_v52  ;;  %vm434_vm12 = vcmp.eq.s32.totalorder %v401_v57, %v432_v52 }
  0xbe   : > { %v1151_v15 = vpop.xlane.xlu0 %570 }
  0xbf   : > { %v573_v16 = vrot.slane %v1151_v15, 1  ;;  %v588_v17 = vsub.f32 %v1106_v53, %v1151_v15  ;;  %v574_v18 = vrot.slane %v1151_v15, 2  ;;  %v575_v19 = vrot.slane %v1151_v15, 3 }
  0xc0   : > { %v576_v20 = vrot.slane %v1151_v15, 4  ;;  %v577_v21 = vrot.slane %v1151_v15, 5  ;;  %v578_v22 = vrot.slane %v1151_v15, 6  ;;  %v579_v23 = vrot.slane %v1151_v15, 7 }
  0xc1   : > { %v596_v24 = vmul.f32 1.442695, %v588_v17  ;;  %v589_v25 = vsub.f32 %v1108_v54, %v573_v16  ;;  %v590_v26 = vsub.f32 %v1110_v55, %v574_v18  ;;  %v591_v27 = vsub.f32 %v1112_v56, %v575_v19 }
  0xc2   : > { %v592_v28 = vsub.f32 %v1117_v62, %v576_v20  ;;  %v593_v29 = vsub.f32 %v1119_v63, %v577_v21  ;;  %v594_v30 = vsub.f32 %v1121_v0, %v578_v22  ;;  %v1168_v31 = vpop.xlane.xlu0 %403  ;;  %v595_v32 = vsub.f32 %v1130_v3, %v579_v23 }
  0xc3   : > { %v598_v33 = vmul.f32 1.442695, %v589_v25  ;;  %v600_v34 = vmul.f32 1.442695, %v590_v26  ;;  %v602_v35 = vmul.f32 1.442695, %v591_v27  ;;  %926 = vpow2.f32 %v596_v24 }
  0xc4   : > { %v604_v36 = vmul.f32 1.442695, %v592_v28  ;;  %v405_v37 = vsub.f32 %v1141_v10, %v1168_v31  ;;  %v606_v38 = vmul.f32 1.442695, %v593_v29  ;;  %v406_v39 = vsub.f32 %v1144_v11, %v1168_v31  ;;  %v417_v27 = vld [vmem:[%s375_s22] sm:$0xff]  ;;  %s720_s22 = smul.f32 (!%p874_p6), 0.5, %s719_s20 }
  0xc5   : > { %928 = vpow2.f32 %v598_v33  ;;  %v608_v40 = vmul.f32 1.442695, %v594_v30  ;;  %v610_v41 = vmul.f32 1.442695, %v595_v32 }
  0xc6   : > { %930 = vpow2.f32 %v600_v34  ;;  %v407_v42 = vmul.f32 1.442695, %v405_v37  ;;  %v409_v43 = vmul.f32 1.442695, %v406_v39 }
  0xc7   : > { %932 = vpow2.f32 %v602_v35 }
  0xc8   : > { %934 = vpow2.f32 %v604_v36 }
  0xc9   : > { %936 = vpow2.f32 %v606_v38 }
  0xca   : > { %938 = vpow2.f32 %v608_v40  ;;  %v449_v58 = vpop.permute.xlu0 %448 }
  0xcb   : > { %940 = vpow2.f32 %v610_v41  ;;  %vm450_vm11 = vcmp.eq.s32.totalorder %v400_v45, %v449_v58  ;;  %vm451_vm13 = vcmp.eq.s32.totalorder %v401_v57, %v449_v58 }
  0xcc   : > { %942 = vpow2.f32 %v407_v42 }
  0xcd   : > { %944 = vpow2.f32 %v409_v43  ;;  %v927_v46 = vpop.eup %926 }
  0xcf   : > { %v929_v47 = vpop.eup %928 }
  0xd0   : > { %v931_v48 = vpop.eup %930  ;;  %v620_v49 = vrot.slane %v929_v47, 7 }
  0xd1   : > { %v933_v50 = vpop.eup %932  ;;  %v622_v51 = vrot.slane %v931_v48, 6 }
  0xd2   : > { %v935_v59 = vpop.eup %934  ;;  %v621_v60 = vsel %vm553_vm2, %v620_v49, %v927_v46  ;;  %v624_v61 = vrot.slane %v933_v50, 5 }
  0xd3   : > { %v937_v1 = vpop.eup %936  ;;  %v623_v2 = vsel %vm555_vm3, %v622_v51, %v621_v60  ;;  %v626_v4 = vrot.slane %v935_v59, 4 }
  0xd4   : > { %v939_v5 = vpop.eup %938  ;;  %v625_v6 = vsel %vm557_vm4, %v624_v61, %v623_v2  ;;  %v628_v7 = vrot.slane %v937_v1, 3 }
  0xd5   : > { %v941_v8 = vpop.eup %940  ;;  %v627_v9 = vsel %vm559_vm5, %v626_v4, %v625_v6  ;;  %v630_v12 = vrot.slane %v939_v5, 2 }
  0xd6   : > { %v943_v13 = vpop.eup %942  ;;  %v629_v14 = vsel %vm561_vm6, %v628_v7, %v627_v9  ;;  %v632_v16 = vrot.slane %v941_v8, 1 }
  0xd7   : > { %v945_v17 = vpop.eup %944  ;;  %v631_v18 = vsel %vm563_vm7, %v630_v12, %v629_v14  ;;  %v435_v19 = vsel %vm433_vm10, %v943_v13, 0.0  ;;  %v452_v20 = vsel %vm450_vm11, %v943_v13, 0.0 }
  0xd8   : > { %v633_v21 = vsel %vm565_vm8, %v632_v16, %v631_v18  ;;  %v436_v22 = vsel %vm434_vm12, %v945_v17, 0.0  ;;  %v453_v23 = vsel %vm451_vm13, %v945_v17, 0.0  ;;  %v411_v28 = vadd.f32 %v945_v17, %v943_v13 }
  0xd9   : > { %v635_v24 = vsel %vm568_vm9, %v633_v21, 0.0  ;;  %v437_v25 = vadd.f32 %v436_v22, %v435_v19  ;;  %v454_v26 = vadd.f32 %v453_v23, %v452_v20 }
  0xda   : > { %636 = vadd.xlane.f32.xlu1 %v635_v24 }
  0xdb   : > { %438 = vadd.xlane.f32.xlu0 %v437_v25 }
  0xeb   : > { %419 = vperm.xlu1 %924, %v417_v27  }
 0x10f   : > { %412 = vadd.xlane.f32.xlu1 %v411_v28 }
 0x113   : > { %455 = vadd.xlane.f32.xlu1 %v454_v26 }
 0x167   : > { %v637_v29 = vpop.xlane.xlu1 %636 }
 0x168   : > { %946 = vlog2.f32 %v637_v29  ;;  %v439_v5 = vpop.xlane.xlu0 %438 }
 0x16b   : > { %v420_v30 = vpop.permute.xlu1 %419 }
 0x16c   : > { %vm421_vm14 = vcmp.eq.s32.totalorder %v400_v45, %v420_v30  ;;  %vm422_vm15 = vcmp.eq.s32.totalorder %v401_v57, %v420_v30 }
 0x16d   : > { %v423_v32 = vsel %vm421_vm14, %v1141_v10, 0.0  ;;  %v424_v33 = vsel %vm422_vm15, %v1144_v11, 0.0 }
 0x16e   : > { %v425_v34 = vadd.f32 %v424_v33, %v423_v32 }
 0x170   : > { %426 = vadd.xlane.f32.xlu1 %v425_v34 }
 0x172   : > { %v947_v35 = vpop.eup %946 }
 0x173   : > { %v639_v36 = vmul.f32 0.6931472, %v947_v35 }
 0x175   : > { %v640_v37 = vadd.f32 %v639_v36, %v1151_v15 }
 0x177   : > { %v642_v38 = vrot.slane %v640_v37, 1  ;;  %v643_v39 = vrot.slane %v640_v37, 2  ;;  %v644_v40 = vrot.slane %v640_v37, 3  ;;  %v645_v41 = vrot.slane %v640_v37, 4 }
 0x178   : > { %v646_v42 = vrot.slane %v640_v37, 5  ;;  %v647_v43 = vrot.slane %v640_v37, 6  ;;  %v648_v44 = vrot.slane %v640_v37, 7  ;;  %v657_v47 = vsub.f32 %v1106_v53, %v640_v37 }
 0x179   : > { %v658_v45 = vsub.f32 %v1108_v54, %v642_v38  ;;  %v659_v46 = vsub.f32 %v1110_v55, %v643_v39  ;;  %v660_v10 = vsub.f32 %v1112_v56, %v644_v40  ;;  %v661_v11 = vsub.f32 %v1117_v62, %v645_v41 }
 0x17a   : > { %v662_v15 = vsub.f32 %v1119_v63, %v646_v42  ;;  %v663_v50 = vsub.f32 %v1121_v0, %v647_v43  ;;  %v664_v51 = vsub.f32 %v1130_v3, %v648_v44  ;;  %v665_v63 = vld [vmem:[%s389_s11] sm:$0xff] }
 0x17b   : > { %v675_v48 = vrot.slane %v658_v45, 7  ;;  %v677_v49 = vrot.slane %v659_v46, 6  ;;  %v679_v54 = vrot.slane %v660_v10, 5  ;;  %v681_v57 = vrot.slane %v661_v11, 4  ;;  %v463_v46 = vld [vmem:[#allocation2] sm:$0x1] }
 0x17c   : > { %v683_v58 = vrot.slane %v662_v15, 3  ;;  %v685_v53 = vrot.slane %v663_v50, 2  ;;  %v687_v3 = vrot.slane %v664_v51, 1 }
 0x17d   : > { %v676_v52 = vsel %vm553_vm2, %v675_v48, %v657_v47  ;;  %v666_v47 = vld [vmem:[#allocation3] sm:$0x1] }
 0x17e   : > { %v678_v55 = vsel %vm555_vm3, %v677_v49, %v676_v52 }
 0x17f   : > { %v680_v56 = vsel %vm557_vm4, %v679_v54, %v678_v55 }
 0x180   : > { %v682_v62 = vsel %vm559_vm5, %v681_v57, %v680_v56 }
 0x181   : > { %v684_v0 = vsel %vm561_vm6, %v683_v58, %v682_v62 }
 0x182   : > { %v686_v59 = vsel %vm563_vm7, %v685_v53, %v684_v0 }
 0x183   : > { %v688_v60 = vsel %vm565_vm8, %v687_v3, %v686_v59 }
 0x184   : > { %v690_v61 = vmul.f32 %v688_v60, %v665_v63 }
 0x186   : > { %v691_v1 = vsel %vm568_vm9, %v690_v61, 0.0 }
 0x187   : > { %692 = vadd.xlane.f32.xlu1 %v691_v1 }
 0x19c   : > { %v413_v2 = vpop.xlane.xlu1 %412 }
 0x19d   : > { %948 = vrcp.f32 %v413_v2 }
 0x1a0   : > { %v456_v7 = vpop.xlane.xlu1 %455 }
 0x1a7   : > { %v949_v4 = vpop.eup %948 }
 0x1a8   : > { %v441_v6 = vmul.f32 %v949_v4, %v439_v5  ;;  %v457_v9 = vmul.f32 %v949_v4, %v456_v7 }
 0x1aa   : > { %v442_v8 = vsub.f32 1.0, %v441_v6  ;;  %v458_v13 = vsub.f32 1.0, %v457_v9 }
 0x1ac   : > { %v443_v12 = vmax.f32 %v442_v8, 1e-12  ;;  %v459_v14 = vmax.f32 %v458_v13, 1e-12 }
 0x1ae   : > { %950 = vlog2.f32 %v443_v12 }
 0x1af   : > { %952 = vlog2.f32 %v413_v2 }
 0x1b0   : > { %954 = vlog2.f32 %v459_v14 }
 0x1b8   : > { %v951_v16 = vpop.eup %950 }
 0x1b9   : > { %v953_v17 = vpop.eup %952  ;;  %v445_v18 = vmul.f32 0.6931472, %v951_v16 }
 0x1ba   : > { %v955_v19 = vpop.eup %954  ;;  %v415_v20 = vmul.f32 0.6931472, %v953_v17 }
 0x1bb   : > { %v446_v21 = vsub.f32 0.0, %v445_v18  ;;  %v461_v22 = vmul.f32 0.6931472, %v955_v19 }
 0x1bc   : > { %v416_v23 = vadd.f32 %v415_v20, %v1168_v31 }
 0x1bd   : > { %v462_v26 = vsub.f32 %v446_v21, %v461_v22 }
 0x1fd   : > { %v427_v24 = vpop.xlane.xlu1 %426 }
 0x1fe   : > { %v428_v25 = vsub.f32 %v416_v23, %v427_v24 }
 0x200   : > { %v464_v27 = vadd.f32 %v462_v26, %v428_v25 }
 0x202   : > { %v466_v28 = vsel %vm465_vm0, %v464_v27, 0.0 }
 0x203   : > { %467 = vadd.xlane.f32.xlu1 %v466_v28 }
 0x214   : > { %v693_v29 = vpop.xlane.xlu1 %692 }
 0x215   : > { %v694_v30 = vsub.f32 0.0, %v693_v29 }
 0x217   : > { %v695_v32 = vsel %vm465_vm0, %v694_v30, 0.0 }
 0x218   : > { %696 = vadd.xlane.f32.xlu1 %v695_v32 }
 0x290   : > { %v468_v33 = vpop.xlane.xlu1 %467 }
 0x291   : > { %v469_v34 = vrot.slane %v468_v33, 4 }
 0x293   : > { %v470_v35 = vadd.f32 %v469_v34, %v468_v33 }
 0x295   : > { %v471_v36 = vrot.slane %v470_v35, 2 }
 0x297   : > { %v472_v37 = vadd.f32 %v471_v36, %v470_v35 }
 0x299   : > { %v473_v38 = vrot.slane %v472_v37, 1 }
 0x29b   : > { %v474_v39 = vadd.f32 %v473_v38, %v472_v37 }
 0x29d   : > { %884 = vpush %v474_v39 }
 0x2a5   : > { %v697_v31 = vpop.xlane.xlu1 %696 }
 0x2a6   : > { %v698_v40 = vrot.slane %v697_v31, 4 }
 0x2a8   : > { %v699_v41 = vadd.f32 %v698_v40, %v697_v31 }
 0x2aa   : > { %v700_v42 = vrot.slane %v699_v41, 2 }
 0x2ac   : > { %v701_v43 = vadd.f32 %v700_v42, %v699_v41 }
 0x2ae   : > { %v702_v44 = vrot.slane %v701_v43, 1 }
 0x2b0   : > { %v703_v45 = vadd.f32 %v702_v44, %v701_v43 }
 0x2b2   : > { %886 = vpush %v703_v45 }
 0x2ce   : > { %s885_s16 = spop %884 }
 0x2cf   : > { %v476_v10 = vstv %s885_s16 }
 0x2d0   : > { %v477_v11 = vadd.f32 %v476_v10, %v463_v46 }
 0x2d2   : > { %479 = vst.msk [vmem:[#allocation2] sm:$0x1] %vm478_vm1, %v477_v11 }
 0x2d9   : > { %v712_v49 = vld [vmem:[#allocation2] sm:$0x1] (!%p874_p6) }
 0x2da   : > { %888 = vpush (!%p874_p6), %v712_v49 }
 0x2e1   : > { %711 = sbr.rel (%p874_p6) target bundleno = 806 (0x326), region = 56 }
 0x2e3   : > { %s887_s19 = spop %886 }
 0x2e4   : > { %v705_v15 = vstv %s887_s19 }
 0x2e5   : > { %v706_v48 = vadd.f32 %v705_v15, %v666_v47 }
 0x2e7   : > { %707 = vst.msk [vmem:[#allocation3] sm:$0x1] %vm478_vm1, %v706_v48 }
 0x2ee   : > { %v715_v50 = vld [vmem:[#allocation3] sm:$0x1] }
 0x2ef   : > { %890 = vpush %v715_v50 }
 0x30b   : > { %s889_s23 = spop %888 }
 0x30c   : > { %s714_s24 = smul.f32 0.0625, %s889_s23 }
 0x30e   : > { %s721_s27 = sadd.f32 %s720_s22, %s714_s24 }
 0x30f   : > { %727 = sst [smem:[#allocation8]] %s714_s24 }
 0x310   : > { %s723_s29 = sadd.f32 %s722_s21, %s721_s27 }
 0x312   : > { %725 = sst [smem:[#allocation6]] %s723_s29 }
 0x320   : > { %s891_s25 = spop %890 }
 0x321   : > { %s717_s26 = smul.f32 0.0625, %s891_s25 }
 0x323   : > { %s718_s28 = smul.f32 0.3, %s717_s26 }
 0x325   : > { %729 = sst [smem:[#allocation10]] %s718_s28 }
 0x326 PF: > { %p904_p7 = scmp.eq.s32.totalorder %s1076_s14, 1  ;;  %s956_s11 = scalar_lea.hbm %s1282_s8, 16 }
 0x327   : > { %p957_p8 = scmp.ne.s32.totalorder %s1282_s8, %s956_s11  ;;  %p962_p11 = scmp.lt.u32.totalorder %s956_s11, %s1282_s8 }
 0x329   : > { %p958_p9 = pnand %p957_p8, %p904_p7 }
 0x32b   : > { %p959_p10 = pneg %p958_p9 }
 0x32d   : > { %p964_p12 = pnand %p962_p11, %p959_p10 }
 0x32f   : > { %967 = shalt.err (!%p964_p12)
}
 0x330   : > { %s1011_s17 = smov [#allocation8]   ;;  %s968_s21 = scalar_lea.hbm %s1281_s7, 16 }
 0x331   : > { %895 = dma.smem_to_hbm (%p904_p7), %s1011_s17, 16, %s1282_s8, [#allocation9]  }
 0x332   : > { %p969_p13 = scmp.ne.s32.totalorder %s1281_s7, %s968_s21  ;;  %p974_p2 = scmp.lt.u32.totalorder %s968_s21, %s1281_s7 }
 0x334   : > { %p970_p0 = pnand %p969_p13, %p904_p7 }
 0x336   : > { %p971_p1 = pneg %p970_p0 }
 0x338   : > { %p976_p3 = pnand %p974_p2, %p971_p1 }
 0x33a   : > { %979 = shalt.err (!%p976_p3)
}
 0x33b   : > { %s1012_s26 = smov [#allocation6]   ;;  %s980_s10 = scalar_lea.hbm %s1283_s9, 16 }
 0x33c   : > { %893 = dma.smem_to_hbm (%p904_p7), %s1012_s26, 16, %s1281_s7, [#allocation7]  }
 0x33d   : > { %p981_p4 = scmp.ne.s32.totalorder %s1283_s9, %s980_s10  ;;  %p986_p8 = scmp.lt.u32.totalorder %s980_s10, %s1283_s9 }
 0x33f   : > { %p982_p5 = pnand %p981_p4, %p904_p7 }
 0x341   : > { %p983_p6 = pneg %p982_p5 }
 0x343   : > { %p988_p9 = pnand %p986_p8, %p983_p6 }
 0x345   : > { %991 = shalt.err (!%p988_p9)
}
 0x346   : > { %s1013_s15 = smov [#allocation10]  }
 0x347   : > { %897 = dma.smem_to_hbm (%p904_p7), %s1013_s15, 16, %s1283_s9, [#allocation9]  }
 0x348   : > { %997 = dma.done.wait (%p904_p7), [#allocation7], 16  }
 0x349   : > { %999 = vsyncadd (%p904_p7), [#allocation7], 4294967280 }
 0x34a   : > { %1001 = dma.done.wait (%p904_p7), [#allocation9], 32  }
 0x34b   : > { %1003 = vsyncadd (%p904_p7), [#allocation9], 4294967264 }
 0x34c   : > { %769 = sfence }
 0x34d PF: > { %s24_s13 = sadd.s32 1, %s1006_s13  }
 0x34e   : > { %p21_p10 = scmp.ge.s32.totalorder %s24_s13, 4  }
 0x350   :  { %23 = sbr.rel (!%p21_p10) target bundleno = 5 (0x5), region = 114 }
 0x357   :  { %775 = vsyncpa [#allocation7], 1 }
 0x358   :  { %777 = vsyncpa [#allocation7 + $0x1], 1 }
 0x359   :  { %778 = vsyncpa [#allocation9], 1 }

</bundles_post_ra>
